<compile_context>
chip_gen: v7x
topology: tpu7x:2x2x1
jax: 0.10.0
libtpu: 0.0.40
codegen_flags: <defaults>
</compile_context>

<pallas_src>
import functools

import jax
import jax.numpy as jnp
from jax.experimental import pallas as pl
from jax.experimental.pallas import tpu as pltpu


# --------------------------------------------------------------------------------------
# Kernel 1: fused QKV projection (bf16 MXU operands, f32 accumulation, bf16 output)
# --------------------------------------------------------------------------------------
def _qkv_proj_kernel(h_ref, w_ref, qkv_ref):
    h = h_ref[0].astype(jnp.bfloat16)                                   # (Tp, E)
    qkv = jnp.dot(h, w_ref[...], preferred_element_type=jnp.float32)    # (Tp, 3E)
    qkv_ref[0] = qkv.astype(qkv_ref.dtype)


# --------------------------------------------------------------------------------------
# Kernel 2: attention with resident full-length K/V, head-pair batching and deferred,
#           fused o_proj.  grid = (B, q_tiles, head_pairs); head-pair axis innermost.
# --------------------------------------------------------------------------------------
def _attn_kernel(q_ref, k_ref, v_ref, mask_ref, wo_ref, o_ref, ctx_ref, *,
                 heads_per_step, head_pairs):
    hp = pl.program_id(2)
    G = heads_per_step

    # Pre-rotated, pre-scaled q; pre-rotated k (RoPE hoisted to the wrapper prologue).
    q = q_ref[0]                                    # (G, Tq, D) bf16
    k = k_ref[0]                                    # (G, P,  D) bf16
    v = v_ref[0]                                    # (G, P,  D) bf16

    # Scores against the FULL key length for this head pair (K/V resident in VMEM).
    s = jnp.einsum("gqd,gkd->gqk", q, k,
                   preferred_element_type=jnp.float32)                  # (G, Tq, P)
    s = s + mask_ref[...][None, :, :].astype(jnp.float32)

    # Plain full-row softmax (no online-softmax bookkeeping needed: rows are complete).
    m = jnp.max(s, axis=-1, keepdims=True)
    p = jnp.exp(s - m)
    l = jnp.sum(p, axis=-1, keepdims=True)
    ctx = jnp.einsum("gqk,gkd->gqd", p.astype(jnp.bfloat16), v,
                     preferred_element_type=jnp.float32)                # (G, Tq, D)
    ctx = ctx * pl.reciprocal(l, approx=True)

    # Pack this pair's normalized context as a lane-dense (Tq, G*D) slab and stash it.
    pair = jnp.concatenate([ctx[g] for g in range(G)], axis=-1)         # (Tq, G*D)
    ctx_ref[hp] = pair.astype(jnp.bfloat16)

    @pl.when(hp == head_pairs - 1)
    def _():
        # Deferred o_proj: one pass over the per-pair context slabs against the fully
        # resident wo (depth-(G*D) matmuls), then a single lane-dense (Tq, E) store.
        bq = o_ref.shape[1]
        e = o_ref.shape[2]
        acc = jnp.zeros((bq, e), jnp.float32)
        for j in range(head_pairs):
            acc = acc + jnp.dot(ctx_ref[j], wo_ref[j],
                                preferred_element_type=jnp.float32)
        o_ref[0] = acc.astype(o_ref.dtype)


# --------------------------------------------------------------------------------------
# Wrapper
# --------------------------------------------------------------------------------------
def pixtral_attention(hidden, wq, wk, wv, wo, cos, sin, mask, *,
                      num_heads, head_dim, block_q=256, block_p=256):
    B, P, E = hidden.shape
    H, D = num_heads, head_dim
    assert E == H * D
    bq = min(block_q, P)
    bp = min(block_p, P)
    assert P % bq == 0 and P % bp == 0
    scaling = float(D) ** -0.5

    # Heads processed per grid step (lane-dense 128-wide o_proj slab when D divides 128).
    if D <= 128 and 128 % D == 0 and H % (128 // D) == 0:
        G = 128 // D
    else:
        G = 1
    HP = H // G

    # ---------------- 1) fused QKV projection ----------------
    wqkv = jnp.concatenate([wq, wk, wv], axis=1).astype(jnp.bfloat16)     # (E, 3E)
    qkv_cost = pl.CostEstimate(
        flops=2 * B * P * E * 3 * E,
        transcendentals=0,
        bytes_accessed=B * P * E * hidden.dtype.itemsize + E * 3 * E * 2 + B * P * 3 * E * 2)
    qkv = pl.pallas_call(
        _qkv_proj_kernel,
        out_shape=jax.ShapeDtypeStruct((B, P, 3 * E), jnp.bfloat16),
        grid=(B, P // bp),
        in_specs=[
            pl.BlockSpec((1, bp, E), lambda b, i: (b, i, 0)),      # hidden tile
            pl.BlockSpec((E, 3 * E), lambda b, i: (0, 0)),         # fused qkv weight (resident)
        ],
        out_specs=pl.BlockSpec((1, bp, 3 * E), lambda b, i: (b, i, 0)),
        compiler_params=pltpu.CompilerParams(
            dimension_semantics=("parallel", "parallel"),
            vmem_limit_bytes=48 * 1024 * 1024),
        cost_estimate=qkv_cost,
    )(hidden, wqkv)
    # TODO(synk): v7x-only — cast wqkv/wo to fp8 for ~2x projection MXU throughput.

    # ---------------- 2) prologue: heads-major split + RoPE (hoisted out of the kernel) --
    # One fused XLA pass: view/transpose + rotate_half + cos/sin + 1/sqrt(d) + bf16 cast.
    # TODO(synk): fold this pass into kernel 1 (per-head blocked roll) to drop the extra
    # HBM round-trip entirely.
    def split_heads(x):
        return x.reshape(B, P, H, D).transpose(0, 2, 1, 3)               # (B, H, P, D)

    qh = split_heads(qkv[..., :E]).astype(jnp.float32)
    kh = split_heads(qkv[..., E:2 * E]).astype(jnp.float32)
    vh = split_heads(qkv[..., 2 * E:])                                   # bf16

    def rot_half(x):
        h2 = D // 2
        return jnp.concatenate([-x[..., h2:], x[..., :h2]], axis=-1)

    c = cos.astype(jnp.float32)[None, None]
    s = sin.astype(jnp.float32)[None, None]
    q_rot = ((qh * c + rot_half(qh) * s) * scaling).astype(jnp.bfloat16)
    k_rot = (kh * c + rot_half(kh) * s).astype(jnp.bfloat16)

    mask_b = mask.astype(jnp.bfloat16)                 # additive mask, (P, P)
    wo_r = wo.astype(jnp.bfloat16).reshape(HP, G * D, E)   # free leading-dim reshape

    # ---------------- 3) attention + deferred fused o_proj ----------------
    flash_cost = pl.CostEstimate(
        flops=4 * B * H * P * P * D + 2 * B * P * E * E,
        transcendentals=B * H * P * P,
        bytes_accessed=(3 * B * H * P * D * 2                 # q, k, v (k/v once per head)
                        + B * (P // bq) * bq * P * 2          # mask (once per q tile)
                        + E * E * 2                            # wo
                        + B * P * E * hidden.dtype.itemsize))  # output

    out = pl.pallas_call(
        functools.partial(_attn_kernel, heads_per_step=G, head_pairs=HP),
        out_shape=jax.ShapeDtypeStruct((B, P, E), hidden.dtype),
        grid=(B, P // bq, HP),
        in_specs=[
            pl.BlockSpec((1, G, bq, D), lambda b, qi, hp: (b, hp, qi, 0)),  # q tile
            pl.BlockSpec((1, G, P, D), lambda b, qi, hp: (b, hp, 0, 0)),    # full K (head pair)
            pl.BlockSpec((1, G, P, D), lambda b, qi, hp: (b, hp, 0, 0)),    # full V (head pair)
            pl.BlockSpec((bq, P), lambda b, qi, hp: (qi, 0)),               # additive mask rows
            pl.BlockSpec((HP, G * D, E), lambda b, qi, hp: (0, 0, 0)),      # wo (resident)
        ],
        out_specs=pl.BlockSpec((1, bq, E), lambda b, qi, hp: (b, qi, 0)),
        scratch_shapes=[
            pltpu.VMEM((HP, bq, G * D), jnp.bfloat16),     # per-pair context slabs
        ],
        compiler_params=pltpu.CompilerParams(
            # b/q-tile axes parallel (megacore work split); head-pair axis carries the
            # context scratch + output write, so it is "arbitrary".
            dimension_semantics=("parallel", "parallel", "arbitrary"),
            # v7x has only 64 MiB VMEM/TC — keep the scoped limit below that.
            vmem_limit_bytes=56 * 1024 * 1024),
        cost_estimate=flash_cost,
    )(q_rot, k_rot, vh, mask_b, wo_r)
    # TODO(synk): for multi-image Pixtral masks at very large P, generate the block-diagonal
    # mask in-kernel from scalar-prefetched per-image boundaries and skip kv ranges that
    # cannot intersect the q tile (also bounds the (G, bq, P) score intermediate).
    return out


# --------------------------------------------------------------------------------------
# Pure-JAX f32 reference mirroring the torch forward (for validation).
# --------------------------------------------------------------------------------------
def _reference(hidden, wq, wk, wv, wo, cos, sin, mask, num_heads, head_dim):
    B, P, E = hidden.shape
    scaling = float(head_dim) ** -0.5
    q = hidden @ wq
    k = hidden @ wk
    v = hidden @ wv

    def sh(x):
        return x.reshape(B, P, num_heads, head_dim).transpose(0, 2, 1, 3)
    q, k, v = sh(q), sh(k), sh(v)

    def rot_half(x):
        h2 = x.shape[-1] // 2
        return jnp.concatenate([-x[..., h2:], x[..., :h2]], axis=-1)

    c = cos[None, None]
    s = sin[None, None]
    q = q * c + rot_half(q) * s
    k = k * c + rot_half(k) * s
    w = jnp.einsum("bhqd,bhkd->bhqk", q, k) * scaling + mask[None, None]
    w = jax.nn.softmax(w.astype(jnp.float32), axis=-1)
    o = jnp.einsum("bhqk,bhkd->bhqd", w, v)
    o = o.transpose(0, 2, 1, 3).reshape(B, P, E)
    return o @ wo


if __name__ == "__main__":
    B, P = 2, 256
    num_heads, head_dim = 2, 64
    E = num_heads * head_dim   # 128

    key = jax.random.PRNGKey(0)
    k_h, k_q, k_k, k_v, k_o = jax.random.split(key, 5)

    hidden = jax.random.normal(k_h, (B, P, E), dtype=jnp.float32)
    wq = jax.random.normal(k_q, (E, E), dtype=jnp.float32) * 0.05
    wk = jax.random.normal(k_k, (E, E), dtype=jnp.float32) * 0.05
    wv = jax.random.normal(k_v, (E, E), dtype=jnp.float32) * 0.05
    wo = jax.random.normal(k_o, (E, E), dtype=jnp.float32) * 0.05

    # Rotary tables (HF convention: emb = cat(freqs, freqs)).
    inv_freq = 1.0 / (10000.0 ** (jnp.arange(0, head_dim, 2, dtype=jnp.float32) / head_dim))
    pos = jnp.arange(P, dtype=jnp.float32)
    freqs = pos[:, None] * inv_freq[None, :]
    emb = jnp.concatenate([freqs, freqs], axis=-1)
    cos = jnp.cos(emb)
    sin = jnp.sin(emb)

    # Block-diagonal additive mask: two "images" of 128 patches each (Pixtral-style).
    img_id = (jnp.arange(P) >= 128).astype(jnp.int32)
    visible = img_id[:, None] == img_id[None, :]
    mask = jnp.where(visible, 0.0, -1e9).astype(jnp.float32)

    out = pixtral_attention(hidden, wq, wk, wv, wo, cos, sin, mask,
                            num_heads=num_heads, head_dim=head_dim)
    out = jax.block_until_ready(out)

    ref = _reference(hidden, wq, wk, wv, wo, cos, sin, mask, num_heads, head_dim)
    assert out.shape == (B, P, E)
    max_err = jnp.max(jnp.abs(out - ref))
    assert jnp.allclose(out, ref, atol=1e-2, rtol=1e-2), f"mismatch vs reference, max err {max_err}"

    print("KERNEL_OK")
</pallas_src>

<mosaic_0001>
module attributes {stable_mosaic.version = 11 : i64} {
  func.func @_qkv_proj_kernel(%arg0: i32, %arg1: i32, %arg2: memref<1x256x128xf32, #tpu.memory_space<vmem>>, %arg3: memref<128x384xbf16, #tpu.memory_space<vmem>>, %arg4: memref<1x256x384xbf16, #tpu.memory_space<vmem>>) attributes {dimension_semantics = [#tpu.dimension_semantics<parallel>, #tpu.dimension_semantics<parallel>], iteration_bounds = array<i64: 2, 1>, scalar_prefetch = 0 : i64, scratch_operands = 0 : i64, tpu.core_type = #tpu.core_type<tc>, window_params = [{transform_indices = @transform_0, window_bounds = array<i64: 1, 256, 128>}, {pipeline_mode = #tpu.pipeline_mode<synchronous>, transform_indices = @transform_1, window_bounds = array<i64: 128, 384>}, {transform_indices = @transform_2, window_bounds = array<i64: 1, 256, 384>}]} {
    %c0 = arith.constant 0 : index
    %c0_0 = arith.constant 0 : index
    %c0_1 = arith.constant 0 : index
    %0 = vector.load %arg2[%c0, %c0_0, %c0_1] : memref<1x256x128xf32, #tpu.memory_space<vmem>>, vector<1x256x128xf32>
    %1 = vector.shape_cast %0 : vector<1x256x128xf32> to vector<256x128xf32>
    %2 = arith.truncf %1 : vector<256x128xf32> to vector<256x128xbf16>
    %c0_2 = arith.constant 0 : index
    %c0_3 = arith.constant 0 : index
    %3 = vector.load %arg3[%c0_2, %c0_3] : memref<128x384xbf16, #tpu.memory_space<vmem>>, vector<128x384xbf16>
    %cst = arith.constant dense<0.000000e+00> : vector<256x384xf32>
    %4 = tpu.matmul %2, %3, %cst {dimension_numbers = #tpu.dot_dimension_numbers<[1], [0], [0], [1], [0, 0, 1, 1], [], []>} : vector<256x128xbf16>, vector<128x384xbf16>, vector<256x384xf32> -> vector<256x384xf32>
    %5 = arith.truncf %4 : vector<256x384xf32> to vector<256x384xbf16>
    %c0_4 = arith.constant 0 : index
    %c0_5 = arith.constant 0 : index
    %c0_6 = arith.constant 0 : index
    %6 = vector.load %arg4[%c0_4, %c0_5, %c0_6] : memref<1x256x384xbf16, #tpu.memory_space<vmem>>, vector<1x256x384xbf16>
    %7 = vector.shape_cast %6 : vector<1x256x384xbf16> to vector<256x384xbf16>
    %8 = vector.shape_cast %5 : vector<256x384xbf16> to vector<1x256x384xbf16>
    tpu.vector_store %arg4[%c0_4, %c0_5, %c0_6], %8 {strides = array<i32>} : memref<1x256x384xbf16, #tpu.memory_space<vmem>>, vector<1x256x384xbf16>,
    return
  }
  func.func @transform_0(%arg0: i32, %arg1: i32) -> (i32, i32, i32) {
    %c0_i32 = arith.constant 0 : i32
    %c0_i32_0 = arith.constant 0 : i32
    return %arg0, %arg1, %c0_i32 : i32, i32, i32
  }
  func.func @transform_1(%arg0: i32, %arg1: i32) -> (i32, i32) {
    %c0_i32 = arith.constant 0 : i32
    %c0_i32_0 = arith.constant 0 : i32
    %c0_i32_1 = arith.constant 0 : i32
    return %c0_i32, %c0_i32_0 : i32, i32
  }
  func.func @transform_2(%arg0: i32, %arg1: i32) -> (i32, i32, i32) {
    %c0_i32 = arith.constant 0 : i32
    %c0_i32_0 = arith.constant 0 : i32
    return %arg0, %arg1, %c0_i32 : i32, i32, i32
  }
}

</mosaic_0001>

<bundles_post_ra>
// kernel: tpu_custom_call.1
= control target key start
LH: loop header
LB: loop body
LE: loop exit
PB: predicated region body
PF: predicated region fallthrough
CT: control target
= control target key end

     0   :  { %7 = vsyncpa [#allocation3], 0  ;;  %s2151_s0 = inlined_call_operand.hbm [shape: f32[2,256,128], index: 0, kind: input, shape index: {}]   ;;  %s2152_s1 = inlined_call_operand.hbm [shape: bf16[128,384], index: 1, kind: input, shape index: {}]   ;;  %s2153_s2 = inlined_call_operand.hbm [shape: bf16[2,256,384], index: 2, kind: output, shape index: {}]  }
   0x1   :  { %9 = vsyncpa [#allocation3 + $0x1], 0 }
   0x2   :  { %10 = vsyncpa [#allocation6], 0 }
   0x3   :  { %11 = vsyncpa [#allocation4], 0 }
   0x4   :  { %13 = vsyncpa [#allocation4 + $0x1], 0  ;;  %s1798_s9 = smov 0   ;;  %s1800_s10 = smov 0  }
   0x5   :  { %s1802_s11 = smov 0   ;;  %s1804_s12 = smov 0  }
   0x6   :  { %s1806_s13 = smov 0   ;;  %s1808_s14 = smov 0  }
   0x7 LB: > { %s1258_s15 = sadd.s32 4294967295, %s1771_s14   ;;  %s1259_s16 = sadd.s32 4294967294, %s1771_s14   ;;  %s1771_s14 = sphi %s1808_s14, %s19_s14   ;;  %s1767_s13 = sphi %s1806_s13, %s2177_s13   ;;  %s1763_s12 = sphi %s1804_s12, %s2176_s12   ;;  %s1759_s11 = sphi %s1802_s11, %s2175_s11   ;;  %s1755_s10 = sphi %s1800_s10, %s2174_s10   ;;  %s1751_s9 = sphi %s1798_s9, %s2173_s9  }
   0x8   : > { %p53_p0 = scmp.ne.s32.totalorder %s1755_s10, %s1751_s9  ;;  %p1832_p1 = scmp.eq.s32.totalorder %s1258_s15, 0 }
   0x9   : > { %p1836_p2 = scmp.eq.s32.totalorder %s1258_s15, 1  ;;  %p106_p3 = scmp.eq.s32.totalorder %s1259_s16, 1 }
   0xa   : > { %s2158_s17 = scalar_select %p1832_p1, 1, 0 }
   0xb   : > { %s2159_s18 = scalar_select %p1836_p2, 1, 0 }
   0xc   : > { %p1842_p4 = por %p1832_p1, %p53_p0  ;;  %p1260_p5 = scmp.ge.s32.totalorder %s1771_s14, 1 }
   0xd   : > { %p1847_p6 = por %p106_p3, %p53_p0  ;;  %p113_p7 = scmp.lt.s32.totalorder %s1771_s14, 3 }
   0xe   : > { %s2160_s19 = scalar_select %p1842_p4, 1, 0 }
   0xf   : > { %s2161_s20 = scalar_select %p1847_p6, 1, 0 }
  0x10   : > { %p1852_p8 = pnand %p1260_p5, %p113_p7  ;;  %s1773_s22 = smov [#allocation5]  }
  0x11   : > { %s125_s23 = sshll.u32 %s1773_s22, 4  ;;  %s31_s25 = sadd.s32 1, %s1767_s13  ;;  %s126_s23 = int_to_ptr.vmem [resolvable:$true] %s125_s23 }
  0x12   : > { %s2162_s21 = scalar_select %p1852_p8, 1, 0 }
  0x13   : > { %p1523_p9 = pneg %p1852_p8  ;;  %s1627_s28 = scalar_lea.hbm %s2152_s1, 3072 }
  0x14   : > { %p1628_p12 = scmp.ne.s32.totalorder %s2152_s1, %s1627_s28  ;;  %p1634_p5 = scmp.lt.u32.totalorder %s1627_s28, %s2152_s1 }
  0x15   : > { %p1861_p11 = pnand %p1523_p9, %p1832_p1 }
  0x17   : > { %p1629_p13 = pneg %p1861_p11 }
  0x19   : > { %p1630_p0 = pnand %p1629_p13, %p1628_p12 }
  0x1b   : > { %p1631_p3 = pneg %p1630_p0 }
  0x1d   : > { %p1636_p7 = pnand %p1634_p5, %p1631_p3 }
  0x1f   : > { %1639 = shalt.err (!%p1636_p7)
}
  0x20   : > { %s1640_s5 = scalar_lea.vmem %s126_s23, 3072  ;;  %p1648_p1 = scmp.lt.s32.totalorder %s126_s23, %s126_s23 }
  0x21   : > { %p1641_p9 = scmp.ne.s32.totalorder %s126_s23, %s1640_s5  ;;  %p1649_p4 = scmp.lt.s32.totalorder %s1640_s5, %s1640_s5 }
  0x23   : > { %p1643_p10 = pnand %p1641_p9, %p1629_p13  ;;  %p1650_p8 = por %p1649_p4, %p1648_p1 }
  0x25   : > { %p1644_p6 = pneg %p1643_p10 }
  0x27   : > { %p1651_p2 = pnand %p1650_p8, %p1644_p6 }
  0x29   : > { %1654 = shalt.err (!%p1651_p2)
}
  0x2a   : > { %s1774_s6 = smov 192   ;;  %s1775_s7 = smov 12  }
  0x2b   : > { %1526 = dma.hbm_to_vmem [thread:$0]  (!%p1861_p11), %s2152_s1, 3072, %s126_s23, [#allocation6], %s1774_s6, %s1774_s6, %s1775_s7  }
  0x2c   : > { %p33_p1 = scmp.ge.s32.totalorder %s31_s25, 2  ;;  %s40_s16 = sadd.s32 1, %s1759_s11 }
  0x2d   : > { %p47_p2 = scmp.ne.s32.totalorder %s1759_s11, %s1755_s10  ;;  %p48_p4 = scmp.eq.s32.totalorder %s1771_s14, 0 }
  0x2e   : > { %s2179_s25 = smov (%p33_p1, %s31_s25), 0  ;;  %p2165_p8 = scmp.ne.s32.totalorder %s2159_s18, 0 }
  0x2f   : > { %p1888_p6 = por %p48_p4, %p47_p2  ;;  %s35_s24 = ssub.s32 %s1767_s13, %s2179_s25 }
  0x30   : > { %p1894_p10 = por %p2165_p8, %p47_p2  ;;  %p1536_p12 = scmp.lt.s32.totalorder %s1771_s14, 2 }
  0x31   : > { %p38_p11 = scmp.eq.s32.totalorder %s35_s24, 0  ;;  %s139_s23 = sand.u32 1, %s1759_s11  }
  0x32   : > { %s1263_s27 = sshll.u32 %s139_s23, 8  ;;  %s1360_s29 = sshll.u32 %s1767_s13, 12 }
  0x33   : > { %s1903_s28 = scalar_select %p38_p11, %s1759_s11, %s40_s16  }
  0x34   : > { %s1909_s4 = scalar_lea.hbm %s2151_s0, %s1360_s29  ;;  %s143_s18 = scalar_lea.vmem [#allocation2], %s1263_s27 }
  0x35   : > { %s152_s5 = sshll.u32 %s143_s18, 4  ;;  %p1915_p13 = pnand %p1536_p12, %p1888_p6  ;;  %s1911_s5 = int_to_ptr.vmem [resolvable:$true] %s152_s5 }
  0x36   : > { %s1919_s7 = scalar_lea.sflag [#allocation3], %s139_s23  ;;  %s1655_s8 = scalar_lea.hbm %s1909_s4, 4096 }
  0x37   : > { %p1656_p0 = scmp.ne.s32.totalorder %s1909_s4, %s1655_s8  ;;  %p1657_p3 = pneg %p1915_p13 }
  0x38   : > { %s1660_s22 = scalar_lea.hbm %s2151_s0, 8192  ;;  %p1661_p9 = scmp.lt.u32.totalorder %s1909_s4, %s2151_s0 }
  0x39   : > { %p1658_p5 = pnand %p1657_p3, %p1656_p0  ;;  %p1662_p1 = scmp.lt.u32.totalorder %s1660_s22, %s1655_s8 }
  0x3a   : > { %p1664_p4 = scmp.lt.u32.totalorder %s1655_s8, %s1909_s4 }
  0x3b   : > { %p1659_p7 = pneg %p1658_p5  ;;  %p1663_p2 = por %p1662_p1, %p1661_p9 }
  0x3d   : > { %p1665_p6 = por %p1664_p4, %p1663_p2 }
  0x3f   : > { %p1666_p8 = pnand %p1665_p6, %p1659_p7 }
  0x41   : > { %1669 = shalt.err (!%p1666_p8)
}
  0x42   : > { %s1670_s23 = scalar_lea.vmem %s1911_s5, 4096  ;;  %s1776_s29 = smov [#allocation2]  }
  0x43   : > { %p1671_p12 = scmp.ne.s32.totalorder %s1911_s5, %s1670_s23  ;;  %s1675_s30 = sshll.u32 %s1776_s29, 4  ;;  %s1676_s30 = int_to_ptr.vmem [resolvable:$false] %s1675_s30 }
  0x44   : > { %s1677_s3 = scalar_lea.vmem %s1676_s30, 8192  ;;  %p1678_p5 = scmp.lt.s32.totalorder %s1911_s5, %s1676_s30 }
  0x45   : > { %p1673_p11 = pnand %p1671_p12, %p1657_p3  ;;  %p1679_p9 = scmp.lt.s32.totalorder %s1677_s3, %s1670_s23 }
  0x47   : > { %p1674_p0 = pneg %p1673_p11  ;;  %p1680_p1 = por %p1679_p9, %p1678_p5 }
  0x49   : > { %p1681_p2 = pnand %p1680_p1, %p1674_p0 }
  0x4b   : > { %1684 = shalt.err (!%p1681_p2)
}
  0x4c   : > { %s1777_s18 = smov 128   ;;  %s1778_s8 = smov 8  }
  0x4d   : > { %1530 = dma.hbm_to_vmem [thread:$0]  (!%p1915_p13), %s1909_s4, 4096, %s1911_s5, %s1919_s7, %s1777_s18, %s1777_s18, %s1778_s8  }
  0x4e   : > { %p2168_p3 = scmp.ne.s32.totalorder %s2162_s21, 0 }
  0x4f   : > { %s1950_s15 = sand.u32 (!%p2168_p3), 1, %s1755_s10   ;;  %p2169_p7 = scmp.ne.s32.totalorder (!%p2168_p3), %s2160_s19, 0 }
  0x50   : > { %164 = sbr.rel (%p2168_p3) target bundleno = 445 (0x1bd), region = 28  ;;  %s1267_s16 = sshll.u32 (!%p2168_p3), %s1950_s15, 8 }
  0x51   : > { %s167_s22 = scalar_lea.sflag (!%p2168_p3), [#allocation3], %s1950_s15  ;;  %s1954_s24 = scalar_lea.vmem (!%p2168_p3), [#allocation2], %s1267_s16 }
  0x57   : > { %1738 = dma.done.wait (%p2169_p7), %s167_s22, 4096  }
  0x58   : > { %1740 = vsyncadd (%p2169_p7), %s167_s22, 4294963200  ;;  %p2170_p13 = scmp.ne.s32.totalorder %s2158_s17, 0 }
  0x5a   : > { %1742 = dma.done.wait (%p2170_p13), [#allocation6], 3072  }
  0x5b   : > { %1744 = vsyncadd (%p2170_p13), [#allocation6], 4294964224  ;;  %v1779_v0 = vmov 0   ;;  %v1595_v1 = vld [vmem:[#allocation5 + $0x4] ss:$12 sps:$4 sm:$0xff]   ;;  %v199_v18 = vld [vmem:[%s1954_s24 + $0x8] sm:$0xff] }
  0x5c   : > { %438 = vmatprep.mubr.bf16.mxu0 %v1779_v0  ;;  %558 = vmatprep.mubr.bf16.mxu1 %v1779_v0  ;;  %v1597_v2 = vld [vmem:[#allocation5] ss:$12 sps:$4 sm:$0xff]   ;;  %v1598_v3 = vld [vmem:[#allocation5 + $0x1c] ss:$12 sps:$4 sm:$0xff]   ;;  %v1600_v4 = vld [vmem:[#allocation5 + $0x18] ss:$12 sps:$4 sm:$0xff]  }
  0x5d   : > { %406 = vmatprep.subr.bf16.mxu0 %v1595_v1  ;;  %1497 = vmatprep.subr.bf16.mxu1 %v1595_v1  ;;  %v1601_v5 = vld [vmem:[#allocation5 + $0x34] ss:$12 sps:$4 sm:$0xff]   ;;  %v1603_v6 = vld [vmem:[#allocation5 + $0x30] ss:$12 sps:$4 sm:$0xff]   ;;  %v1604_v7 = vld [vmem:[#allocation5 + $0x4c] ss:$12 sps:$4 sm:$0xff]  }
  0x5e   : > { %407 = vmatpush1.bf16.msra.mxu0 %v1597_v2  ;;  %1505 = vmatpush1.bf16.msra.mxu1 %v1597_v2  ;;  %v1606_v8 = vld [vmem:[#allocation5 + $0x48] ss:$12 sps:$4 sm:$0xff]   ;;  %v1607_v9 = vld [vmem:[#allocation5 + $0x64] ss:$12 sps:$4 sm:$0xff]   ;;  %v1609_v10 = vld [vmem:[#allocation5 + $0x60] ss:$12 sps:$4 sm:$0xff]  }
  0x5f   : > { %408 = vmatprep.subr.bf16.mxu0 %v1598_v3  ;;  %1498 = vmatprep.subr.bf16.mxu1 %v1598_v3  ;;  %v1610_v11 = vld [vmem:[#allocation5 + $0x7c] ss:$12 sps:$4 sm:$0xff]   ;;  %v1612_v12 = vld [vmem:[#allocation5 + $0x78] ss:$12 sps:$4 sm:$0xff]   ;;  %v1613_v13 = vld [vmem:[#allocation5 + $0x94] ss:$12 sps:$4 sm:$0xff]  }
  0x60   : > { %v1615_v14 = vld [vmem:[#allocation5 + $0x90] ss:$12 sps:$4 sm:$0xff]   ;;  %v1616_v15 = vld [vmem:[#allocation5 + $0xac] ss:$12 sps:$4 sm:$0xff]   ;;  %v1618_v16 = vld [vmem:[#allocation5 + $0xa8] ss:$12 sps:$4 sm:$0xff]  }
  0x61   : > { %v198_v17 = vld [vmem:[%s1954_s24] sm:$0xff]  ;;  %v223_v20 = vld [vmem:[%s1954_s24 + $0xc8] sm:$0xff]  ;;  %v200_v25 = vld [vmem:[%s1954_s24 + $0x10] sm:$0xff]  ;;  %s1513_s17 = smul.u32 384, %s1950_s15  ;;  %s1145_s7 = scalar_lea.sflag [#allocation4], %s1950_s15 }
  0x62   : > { %409 = vmatpush1.bf16.msra.mxu0 %v1600_v4  ;;  %1506 = vmatpush1.bf16.msra.mxu1 %v1600_v4  ;;  %v222_v19 = vld [vmem:[%s1954_s24 + $0xc0] sm:$0xff]  ;;  %v1619_v21 = vld [vmem:[#allocation5 + $0x8] ss:$12 sps:$4 sm:$0xff]   ;;  %v230_v22 = vpack.c.bf16 %v199_v18, %v198_v17  ;;  %v201_v26 = vld [vmem:[%s1954_s24 + $0x18] sm:$0xff]  ;;  %s1514_s21 = smul.u32 6144, %s1763_s12  ;;  %s1780_s23 = smov [#allocation7]  }
  0x63   : > { %410 = vmatprep.subr.bf16.mxu0 %v1601_v5  ;;  %1499 = vmatprep.subr.bf16.mxu1 %v1601_v5  ;;  %v1970_v23 = vpack.c.bf16 %v223_v20, %v222_v19  ;;  %v1620_v24 = vld [vmem:[#allocation5 + $0x20] ss:$12 sps:$4 sm:$0xff]   ;;  %v224_v27 = vld [vmem:[%s1954_s24 + $0xd0] sm:$0xff]  ;;  %v225_v28 = vld [vmem:[%s1954_s24 + $0xd8] sm:$0xff]  ;;  %v231_v30 = vpack.c.bf16 %v201_v26, %v200_v25  ;;  %s2029_s19 = scalar_lea.vmem [#allocation7], %s1513_s17  ;;  %s1689_s29 = sshll.u32 %s1780_s23, 4  ;;  %s1690_s29 = int_to_ptr.vmem [resolvable:$false] %s1689_s29 }
  0x64   : > { %v1621_v29 = vld [vmem:[#allocation5 + $0x38] ss:$12 sps:$4 sm:$0xff]   ;;  %v1979_v31 = vpack.c.bf16 %v225_v28, %v224_v27  ;;  %v1622_v32 = vld [vmem:[#allocation5 + $0x50] ss:$12 sps:$4 sm:$0xff]   ;;  %v203_v34 = vld [vmem:[%s1954_s24 + $0x28] sm:$0xff]  ;;  %s1161_s4 = sshll.u32 %s2029_s19, 4  ;;  %s2095_s6 = scalar_lea.hbm %s2153_s2, %s1514_s21  ;;  %s2097_s4 = int_to_ptr.vmem [resolvable:$true] %s1161_s4 }
  0x65   : > { %v202_v33 = vld [vmem:[%s1954_s24 + $0x20] sm:$0xff]  ;;  %v227_v36 = vld [vmem:[%s1954_s24 + $0xe8] sm:$0xff]  ;;  %v204_v41 = vld [vmem:[%s1954_s24 + $0x30] sm:$0xff]  ;;  %s1685_s27 = scalar_lea.vmem %s2097_s4, 6144  ;;  %s1691_s30 = scalar_lea.vmem %s1690_s29, 12288 }
  0x66   : > { %411 = vmatpush1.bf16.msra.mxu0 %v1603_v6  ;;  %1507 = vmatpush1.bf16.msra.mxu1 %v1603_v6  ;;  %v226_v35 = vld [vmem:[%s1954_s24 + $0xe0] sm:$0xff]  ;;  %v1623_v37 = vld [vmem:[#allocation5 + $0x68] ss:$12 sps:$4 sm:$0xff]   ;;  %v232_v38 = vpack.c.bf16 %v203_v34, %v202_v33  ;;  %v205_v42 = vld [vmem:[%s1954_s24 + $0x38] sm:$0xff]  ;;  %p1686_p4 = scmp.ne.s32.totalorder %s2097_s4, %s1685_s27  ;;  %p1692_p12 = scmp.lt.s32.totalorder %s2097_s4, %s1690_s29 }
  0x67   : > { %412 = vmatprep.subr.bf16.mxu0 %v1604_v7  ;;  %1500 = vmatprep.subr.bf16.mxu1 %v1604_v7  ;;  %v1988_v39 = vpack.c.bf16 %v227_v36, %v226_v35  ;;  %v1624_v40 = vld [vmem:[#allocation5 + $0x80] ss:$12 sps:$4 sm:$0xff]   ;;  %v228_v43 = vld [vmem:[%s1954_s24 + $0xf0] sm:$0xff]  ;;  %v229_v44 = vld [vmem:[%s1954_s24 + $0xf8] sm:$0xff]  ;;  %v233_v46 = vpack.c.bf16 %v205_v42, %v204_v41  ;;  %p1693_p11 = scmp.lt.s32.totalorder %s1691_s30, %s1685_s27 }
  0x68   : > { %v1625_v45 = vld [vmem:[#allocation5 + $0x98] ss:$12 sps:$4 sm:$0xff]   ;;  %v1997_v47 = vpack.c.bf16 %v229_v44, %v228_v43  ;;  %v1626_v48 = vld [vmem:[#allocation5 + $0xb0] ss:$12 sps:$4 sm:$0xff]   ;;  %v207_v50 = vld [vmem:[%s1954_s24 + $0x48] sm:$0xff]  ;;  %p1687_p6 = pnand %p1686_p4, %p1894_p10 }
  0x69   : > { %v206_v49 = vld [vmem:[%s1954_s24 + $0x40] sm:$0xff]  ;;  %v208_v52 = vld [vmem:[%s1954_s24 + $0x50] sm:$0xff]  ;;  %v209_v53 = vld [vmem:[%s1954_s24 + $0x58] sm:$0xff]  ;;  %p1694_p0 = por %p1693_p11, %p1692_p12 }
  0x6a   : > { %413 = vmatpush1.bf16.msra.mxu0 %v1606_v8  ;;  %1508 = vmatpush1.bf16.msra.mxu1 %v1606_v8  ;;  %v234_v51 = vpack.c.bf16 %v207_v50, %v206_v49  ;;  %v235_v54 = vpack.c.bf16 %v209_v53, %v208_v52  ;;  %v210_v55 = vld [vmem:[%s1954_s24 + $0x60] sm:$0xff]  ;;  %v211_v56 = vld [vmem:[%s1954_s24 + $0x68] sm:$0xff]  ;;  %v212_v58 = vld [vmem:[%s1954_s24 + $0x70] sm:$0xff]  ;;  %p1688_p8 = pneg %p1687_p6 }
  0x6b   : > { %414 = vmatprep.subr.bf16.mxu0 %v1607_v9  ;;  %1501 = vmatprep.subr.bf16.mxu1 %v1607_v9  ;;  %v236_v57 = vpack.c.bf16 %v211_v56, %v210_v55  ;;  %v213_v59 = vld [vmem:[%s1954_s24 + $0x78] sm:$0xff]  ;;  %v214_v60 = vld [vmem:[%s1954_s24 + $0x80] sm:$0xff]  ;;  %v215_v61 = vld [vmem:[%s1954_s24 + $0x88] sm:$0xff] }
  0x6c   : > { %v237_v62 = vpack.c.bf16 %v213_v59, %v212_v58  ;;  %v238_v63 = vpack.c.bf16 %v215_v61, %v214_v60  ;;  %v216_v1 = vld [vmem:[%s1954_s24 + $0x90] sm:$0xff]  ;;  %v217_v2 = vld [vmem:[%s1954_s24 + $0x98] sm:$0xff]  ;;  %v218_v3 = vld [vmem:[%s1954_s24 + $0xa0] sm:$0xff]  ;;  %p1695_p5 = pnand %p1694_p0, %p1688_p8 }
  0x6d   : > { %v219_v4 = vld [vmem:[%s1954_s24 + $0xa8] sm:$0xff]  ;;  %v239_v5 = vpack.c.bf16 %v217_v2, %v216_v1  ;;  %v220_v7 = vld [vmem:[%s1954_s24 + $0xb0] sm:$0xff]  ;;  %v221_v8 = vld [vmem:[%s1954_s24 + $0xb8] sm:$0xff] }
  0x6e   : > { %415 = vmatpush1.bf16.msra.mxu0 %v1609_v10  ;;  %1509 = vmatpush1.bf16.msra.mxu1 %v1609_v10  ;;  %v240_v6 = vpack.c.bf16 %v219_v4, %v218_v3  ;;  %v241_v9 = vpack.c.bf16 %v221_v8, %v220_v7 }
  0x6f   : > { %416 = vmatprep.subr.bf16.mxu0 %v1610_v11  ;;  %1502 = vmatprep.subr.bf16.mxu1 %v1610_v11 }
  0x72   : > { %417 = vmatpush1.bf16.msra.mxu0 %v1612_v12  ;;  %1510 = vmatpush1.bf16.msra.mxu1 %v1612_v12 }
  0x73   : > { %418 = vmatprep.subr.bf16.mxu0 %v1613_v13  ;;  %1503 = vmatprep.subr.bf16.mxu1 %v1613_v13 }
  0x76   : > { %419 = vmatpush1.bf16.msra.mxu0 %v1615_v14  ;;  %1511 = vmatpush1.bf16.msra.mxu1 %v1615_v14 }
  0x77   : > { %420 = vmatprep.subr.bf16.mxu0 %v1616_v15  ;;  %1504 = vmatprep.subr.bf16.mxu1 %v1616_v15 }
  0x7a   : > { %421 = vmatpush1.bf16.msra.mxu0 %v1618_v16  ;;  %1512 = vmatpush1.bf16.msra.mxu1 %v1618_v16 }
  0x7b   : > { %1449 = vmatprep.subr.bf16.mxu1 %v1619_v21 }
  0x7d   : > { %439 = vmatmul.mubr.bf16.vlgmr.msra.gmra.mrb[0].mxu0 %v230_v22  ;;  %559 = vmatmul.mubr.bf16.vlgmr.msra.gmra.mrb[0].mxu1 %v1970_v23 }
  0x7e   : > { %1450 = vmatpush3.bf16.msra.mxu1 %v1619_v21  ;;  %448 = vmatprep.mubr.bf16.mxu0 %v1779_v0 }
  0x7f   : > { %1451 = vmatprep.subr.bf16.mxu1 %v1620_v24  ;;  %568 = vmatprep.mubr.bf16.mxu1 %v1779_v0 }
  0x82   : > { %1452 = vmatpush3.bf16.msra.mxu1 %v1620_v24 }
  0x83   : > { %1453 = vmatprep.subr.bf16.mxu1 %v1621_v29 }
  0x85   : > { %449 = vmatmul.mubr.bf16.gmra.mrb[4].mxu0 %v231_v30  ;;  %569 = vmatmul.mubr.bf16.gmra.mrb[4].mxu1 %v1979_v31 }
  0x86   : > { %1454 = vmatpush3.bf16.msra.mxu1 %v1621_v29  ;;  %458 = vmatprep.mubr.bf16.mxu0 %v1779_v0 }
  0x87   : > { %1455 = vmatprep.subr.bf16.mxu1 %v1622_v32  ;;  %578 = vmatprep.mubr.bf16.mxu1 %v1779_v0 }
  0x8a   : > { %1456 = vmatpush3.bf16.msra.mxu1 %v1622_v32 }
  0x8b   : > { %1457 = vmatprep.subr.bf16.mxu1 %v1623_v37 }
  0x8d   : > { %459 = vmatmul.mubr.bf16.gmra.mrb[8].mxu0 %v232_v38  ;;  %579 = vmatmul.mubr.bf16.gmra.mrb[8].mxu1 %v1988_v39 }
  0x8e   : > { %1458 = vmatpush3.bf16.msra.mxu1 %v1623_v37  ;;  %468 = vmatprep.mubr.bf16.mxu0 %v1779_v0 }
  0x8f   : > { %1459 = vmatprep.subr.bf16.mxu1 %v1624_v40  ;;  %588 = vmatprep.mubr.bf16.mxu1 %v1779_v0 }
  0x92   : > { %1460 = vmatpush3.bf16.msra.mxu1 %v1624_v40 }
  0x93   : > { %1461 = vmatprep.subr.bf16.mxu1 %v1625_v45 }
  0x95   : > { %469 = vmatmul.mubr.bf16.gmra.mrb[12].mxu0 %v233_v46  ;;  %589 = vmatmul.mubr.bf16.gmra.mrb[12].mxu1 %v1997_v47 }
  0x96   : > { %1462 = vmatpush3.bf16.msra.mxu1 %v1625_v45  ;;  %478 = vmatprep.mubr.bf16.mxu0 %v1779_v0 }
  0x97   : > { %1463 = vmatprep.subr.bf16.mxu1 %v1626_v48  ;;  %1465 = vmatprep.mubr.bf16.mxu1 %v230_v22 }
  0x9a   : > { %1464 = vmatpush3.bf16.msra.mxu1 %v1626_v48 }
  0x9d   : > { %479 = vmatmul.mubr.bf16.gmra.mrb[16].mxu0 %v234_v51  ;;  %1466 = vmatmul.mubr.bf16.vlgmr.msra.gmra.mrb[16].mxu1 %v231_v30 }
  0x9e   : > { %488 = vmatprep.mubr.bf16.mxu0 %v1779_v0  ;;  %1469 = vmatprep.mubr.bf16.mxu1 %v232_v38 }
  0xa5   : > { %489 = vmatmul.mubr.bf16.gmra.mrb[20].mxu0 %v235_v54  ;;  %1470 = vmatmul.mubr.bf16.gmra.mrb[20].mxu1 %v233_v46 }
  0xa6   : > { %498 = vmatprep.mubr.bf16.mxu0 %v1779_v0  ;;  %1473 = vmatprep.mubr.bf16.mxu1 %v234_v51 }
  0xad   : > { %499 = vmatmul.mubr.bf16.gmra.mrb[24].mxu0 %v236_v57  ;;  %1474 = vmatmul.mubr.bf16.gmra.mrb[24].mxu1 %v235_v54 }
  0xae   : > { %508 = vmatprep.mubr.bf16.mxu0 %v1779_v0  ;;  %1477 = vmatprep.mubr.bf16.mxu1 %v236_v57 }
  0xb5   : > { %509 = vmatmul.mubr.bf16.gmra.mrb[28].mxu0 %v237_v62  ;;  %1478 = vmatmul.mubr.bf16.gmra.mrb[28].mxu1 %v237_v62 }
  0xb6   : > { %518 = vmatprep.mubr.bf16.mxu0 %v1779_v0  ;;  %1481 = vmatprep.mubr.bf16.mxu1 %v238_v63 }
  0xbd   : > { %519 = vmatmul.mubr.bf16.gmra.mrb[32].mxu0 %v238_v63  ;;  %1482 = vmatmul.mubr.bf16.gmra.mrb[32].mxu1 %v239_v5 }
  0xbe   : > { %528 = vmatprep.mubr.bf16.mxu0 %v1779_v0  ;;  %1485 = vmatprep.mubr.bf16.mxu1 %v240_v6 }
  0xc5   : > { %529 = vmatmul.mubr.bf16.gmra.mrb[36].mxu0 %v239_v5  ;;  %1486 = vmatmul.mubr.bf16.gmra.mrb[36].mxu1 %v241_v9 }
  0xc6   : > { %538 = vmatprep.mubr.bf16.mxu0 %v1779_v0  ;;  %1489 = vmatprep.mubr.bf16.mxu1 %v1970_v23 }
  0xcd   : > { %539 = vmatmul.mubr.bf16.gmra.mrb[40].mxu0 %v240_v6  ;;  %1490 = vmatmul.mubr.bf16.gmra.mrb[40].mxu1 %v1979_v31 }
  0xce   : > { %548 = vmatprep.mubr.bf16.mxu0 %v1779_v0  ;;  %1493 = vmatprep.mubr.bf16.mxu1 %v1988_v39 }
  0xd5   : > { %549 = vmatmul.mubr.bf16.gmra.mrb[44].mxu0 %v241_v9  ;;  %1494 = vmatmul.mubr.bf16.gmra.mrb[44].mxu1 %v1997_v47 }
 0x150   : > { %v440_v10 = vpop.f32.mrb[0].mxu0  ;;  %v560_v11 = vpop.f32.mrb[0].mxu1 }
 0x151   : > { %v442_v12 = vpop.f32.mrb[1].mxu0  ;;  %v562_v13 = vpop.f32.mrb[1].mxu1 }
 0x152   : > { %v1361_v14 = vpack.c.bf16 %v442_v12, %v440_v10  ;;  %v1409_v15 = vpack.c.bf16 %v562_v13, %v560_v11  ;;  %v444_v16 = vpop.f32.mrb[2].mxu0  ;;  %v564_v17 = vpop.f32.mrb[2].mxu1 }
 0x153   : > { %v446_v18 = vpop.f32.mrb[3].mxu0  ;;  %v566_v19 = vpop.f32.mrb[3].mxu1 }
 0x154   : > { %1080 = vst [vmem:[%s2029_s19] sm:$0xff] %v1361_v14  ;;  %1128 = vst [vmem:[%s2029_s19 + $0x120] sm:$0xff] %v1409_v15  ;;  %v1363_v0 = vpack.c.bf16 %v446_v18, %v444_v16  ;;  %v1411_v20 = vpack.c.bf16 %v566_v19, %v564_v17 }
 0x156   : > { %1082 = vst [vmem:[%s2029_s19 + $0xc] sm:$0xff] %v1363_v0  ;;  %1130 = vst [vmem:[%s2029_s19 + $0x12c] sm:$0xff] %v1411_v20 }
 0x158   : > { %v450_v21 = vpop.f32.mrb[4].mxu0  ;;  %v570_v22 = vpop.f32.mrb[4].mxu1 }
 0x159   : > { %v452_v23 = vpop.f32.mrb[5].mxu0  ;;  %v572_v24 = vpop.f32.mrb[5].mxu1 }
 0x15a   : > { %v1365_v25 = vpack.c.bf16 %v452_v23, %v450_v21  ;;  %v1413_v26 = vpack.c.bf16 %v572_v24, %v570_v22  ;;  %v454_v27 = vpop.f32.mrb[6].mxu0  ;;  %v574_v28 = vpop.f32.mrb[6].mxu1 }
 0x15b   : > { %v456_v29 = vpop.f32.mrb[7].mxu0  ;;  %v576_v30 = vpop.f32.mrb[7].mxu1 }
 0x15c   : > { %1084 = vst [vmem:[%s2029_s19 + $0x18] sm:$0xff] %v1365_v25  ;;  %1132 = vst [vmem:[%s2029_s19 + $0x138] sm:$0xff] %v1413_v26  ;;  %v1367_v31 = vpack.c.bf16 %v456_v29, %v454_v27  ;;  %v1415_v32 = vpack.c.bf16 %v576_v30, %v574_v28 }
 0x15e   : > { %1086 = vst [vmem:[%s2029_s19 + $0x24] sm:$0xff] %v1367_v31  ;;  %1134 = vst [vmem:[%s2029_s19 + $0x144] sm:$0xff] %v1415_v32 }
 0x160   : > { %v460_v33 = vpop.f32.mrb[8].mxu0  ;;  %v580_v34 = vpop.f32.mrb[8].mxu1 }
 0x161   : > { %v462_v35 = vpop.f32.mrb[9].mxu0  ;;  %v582_v36 = vpop.f32.mrb[9].mxu1 }
 0x162   : > { %v1369_v37 = vpack.c.bf16 %v462_v35, %v460_v33  ;;  %v1417_v38 = vpack.c.bf16 %v582_v36, %v580_v34  ;;  %v464_v39 = vpop.f32.mrb[10].mxu0  ;;  %v584_v40 = vpop.f32.mrb[10].mxu1 }
 0x163   : > { %v466_v41 = vpop.f32.mrb[11].mxu0  ;;  %v586_v42 = vpop.f32.mrb[11].mxu1 }
 0x164   : > { %1088 = vst [vmem:[%s2029_s19 + $0x30] sm:$0xff] %v1369_v37  ;;  %1136 = vst [vmem:[%s2029_s19 + $0x150] sm:$0xff] %v1417_v38  ;;  %v1371_v43 = vpack.c.bf16 %v466_v41, %v464_v39  ;;  %v1419_v44 = vpack.c.bf16 %v586_v42, %v584_v40 }
 0x166   : > { %1090 = vst [vmem:[%s2029_s19 + $0x3c] sm:$0xff] %v1371_v43  ;;  %1138 = vst [vmem:[%s2029_s19 + $0x15c] sm:$0xff] %v1419_v44 }
 0x168   : > { %v470_v45 = vpop.f32.mrb[12].mxu0  ;;  %v590_v46 = vpop.f32.mrb[12].mxu1 }
 0x169   : > { %v472_v47 = vpop.f32.mrb[13].mxu0  ;;  %v592_v48 = vpop.f32.mrb[13].mxu1 }
 0x16a   : > { %v1373_v49 = vpack.c.bf16 %v472_v47, %v470_v45  ;;  %v1421_v50 = vpack.c.bf16 %v592_v48, %v590_v46  ;;  %v474_v51 = vpop.f32.mrb[14].mxu0  ;;  %v594_v52 = vpop.f32.mrb[14].mxu1 }
 0x16b   : > { %v476_v53 = vpop.f32.mrb[15].mxu0  ;;  %v596_v54 = vpop.f32.mrb[15].mxu1 }
 0x16c   : > { %1092 = vst [vmem:[%s2029_s19 + $0x48] sm:$0xff] %v1373_v49  ;;  %1140 = vst [vmem:[%s2029_s19 + $0x168] sm:$0xff] %v1421_v50  ;;  %v1375_v55 = vpack.c.bf16 %v476_v53, %v474_v51  ;;  %v1423_v56 = vpack.c.bf16 %v596_v54, %v594_v52 }
 0x16e   : > { %1094 = vst [vmem:[%s2029_s19 + $0x54] sm:$0xff] %v1375_v55  ;;  %1142 = vst [vmem:[%s2029_s19 + $0x174] sm:$0xff] %v1423_v56 }
 0x170   : > { %v480_v57 = vpop.f32.mrb[16].mxu0  ;;  %v1467_v58 = vpop.f32.mrb[16].mxu1 }
 0x171   : > { %v1366_v59 = vpack.c.bf16 %v1467_v58, %v1467_v58  ;;  %v482_v60 = vpop.f32.mrb[17].mxu0  ;;  %v633_v61 = vpop.f32.mrb[17].mxu1 }
 0x172   : > { %v1377_v62 = vpack.c.bf16 %v482_v60, %v480_v57  ;;  %v1362_v63 = vpack.c.bf16 %v633_v61, %v633_v61  ;;  %v484_v1 = vpop.f32.mrb[18].mxu0  ;;  %v1468_v2 = vpop.f32.mrb[18].mxu1 }
 0x173   : > { %1085 = vst [vmem:[%s2029_s19 + $0x20] sm:$0xf] %v1366_v59  ;;  %v1368_v3 = vpack.c.bf16 %v1468_v2, %v1468_v2  ;;  %v486_v4 = vpop.f32.mrb[19].mxu0  ;;  %v636_v5 = vpop.f32.mrb[19].mxu1 }
 0x174   : > { %1096 = vst [vmem:[%s2029_s19 + $0x60] sm:$0xff] %v1377_v62  ;;  %1081 = vst [vmem:[%s2029_s19 + $0x8] sm:$0xf] %v1362_v63  ;;  %v1379_v6 = vpack.c.bf16 %v486_v4, %v484_v1  ;;  %v1364_v7 = vpack.c.bf16 %v636_v5, %v636_v5 }
 0x175   : > { %1087 = vst [vmem:[%s2029_s19 + $0x2c] sm:$0xf] %v1368_v3 }
 0x176   : > { %1098 = vst [vmem:[%s2029_s19 + $0x6c] sm:$0xff] %v1379_v6  ;;  %1083 = vst [vmem:[%s2029_s19 + $0x14] sm:$0xf] %v1364_v7 }
 0x178   : > { %v490_v8 = vpop.f32.mrb[20].mxu0  ;;  %v1471_v9 = vpop.f32.mrb[20].mxu1 }
 0x179   : > { %v1374_v10 = vpack.c.bf16 %v1471_v9, %v1471_v9  ;;  %v492_v11 = vpop.f32.mrb[21].mxu0  ;;  %v649_v12 = vpop.f32.mrb[21].mxu1 }
 0x17a   : > { %v1381_v13 = vpack.c.bf16 %v492_v11, %v490_v8  ;;  %v1370_v14 = vpack.c.bf16 %v649_v12, %v649_v12  ;;  %v494_v15 = vpop.f32.mrb[22].mxu0  ;;  %v1472_v16 = vpop.f32.mrb[22].mxu1 }
 0x17b   : > { %1093 = vst [vmem:[%s2029_s19 + $0x50] sm:$0xf] %v1374_v10  ;;  %v1376_v17 = vpack.c.bf16 %v1472_v16, %v1472_v16  ;;  %v496_v18 = vpop.f32.mrb[23].mxu0  ;;  %v652_v19 = vpop.f32.mrb[23].mxu1 }
 0x17c   : > { %1100 = vst [vmem:[%s2029_s19 + $0x78] sm:$0xff] %v1381_v13  ;;  %1089 = vst [vmem:[%s2029_s19 + $0x38] sm:$0xf] %v1370_v14  ;;  %v1383_v0 = vpack.c.bf16 %v496_v18, %v494_v15  ;;  %v1372_v20 = vpack.c.bf16 %v652_v19, %v652_v19 }
 0x17d   : > { %1095 = vst [vmem:[%s2029_s19 + $0x5c] sm:$0xf] %v1376_v17 }
 0x17e   : > { %1102 = vst [vmem:[%s2029_s19 + $0x84] sm:$0xff] %v1383_v0  ;;  %1091 = vst [vmem:[%s2029_s19 + $0x44] sm:$0xf] %v1372_v20 }
 0x180   : > { %v500_v21 = vpop.f32.mrb[24].mxu0  ;;  %v1475_v22 = vpop.f32.mrb[24].mxu1 }
 0x181   : > { %v1382_v23 = vpack.c.bf16 %v1475_v22, %v1475_v22  ;;  %v502_v24 = vpop.f32.mrb[25].mxu0  ;;  %v665_v25 = vpop.f32.mrb[25].mxu1 }
 0x182   : > { %v1385_v26 = vpack.c.bf16 %v502_v24, %v500_v21  ;;  %v1378_v27 = vpack.c.bf16 %v665_v25, %v665_v25  ;;  %v504_v28 = vpop.f32.mrb[26].mxu0  ;;  %v1476_v29 = vpop.f32.mrb[26].mxu1 }
 0x183   : > { %1101 = vst [vmem:[%s2029_s19 + $0x80] sm:$0xf] %v1382_v23  ;;  %v1384_v30 = vpack.c.bf16 %v1476_v29, %v1476_v29  ;;  %v506_v31 = vpop.f32.mrb[27].mxu0  ;;  %v668_v32 = vpop.f32.mrb[27].mxu1 }
 0x184   : > { %1104 = vst [vmem:[%s2029_s19 + $0x90] sm:$0xff] %v1385_v26  ;;  %1097 = vst [vmem:[%s2029_s19 + $0x68] sm:$0xf] %v1378_v27  ;;  %v1387_v33 = vpack.c.bf16 %v506_v31, %v504_v28  ;;  %v1380_v34 = vpack.c.bf16 %v668_v32, %v668_v32 }
 0x185   : > { %1103 = vst [vmem:[%s2029_s19 + $0x8c] sm:$0xf] %v1384_v30 }
 0x186   : > { %1106 = vst [vmem:[%s2029_s19 + $0x9c] sm:$0xff] %v1387_v33  ;;  %1099 = vst [vmem:[%s2029_s19 + $0x74] sm:$0xf] %v1380_v34 }
 0x188   : > { %v510_v35 = vpop.f32.mrb[28].mxu0  ;;  %v1479_v36 = vpop.f32.mrb[28].mxu1 }
 0x189   : > { %v1390_v37 = vpack.c.bf16 %v1479_v36, %v1479_v36  ;;  %v512_v38 = vpop.f32.mrb[29].mxu0  ;;  %v681_v39 = vpop.f32.mrb[29].mxu1 }
 0x18a   : > { %v1389_v40 = vpack.c.bf16 %v512_v38, %v510_v35  ;;  %v1386_v41 = vpack.c.bf16 %v681_v39, %v681_v39  ;;  %v514_v42 = vpop.f32.mrb[30].mxu0  ;;  %v1480_v43 = vpop.f32.mrb[30].mxu1 }
 0x18b   : > { %1109 = vst [vmem:[%s2029_s19 + $0xb0] sm:$0xf] %v1390_v37  ;;  %v1392_v44 = vpack.c.bf16 %v1480_v43, %v1480_v43  ;;  %v516_v45 = vpop.f32.mrb[31].mxu0  ;;  %v684_v46 = vpop.f32.mrb[31].mxu1 }
 0x18c   : > { %1108 = vst [vmem:[%s2029_s19 + $0xa8] sm:$0xff] %v1389_v40  ;;  %1105 = vst [vmem:[%s2029_s19 + $0x98] sm:$0xf] %v1386_v41  ;;  %v1391_v47 = vpack.c.bf16 %v516_v45, %v514_v42  ;;  %v1388_v48 = vpack.c.bf16 %v684_v46, %v684_v46 }
 0x18d   : > { %1111 = vst [vmem:[%s2029_s19 + $0xbc] sm:$0xf] %v1392_v44 }
 0x18e   : > { %1110 = vst [vmem:[%s2029_s19 + $0xb4] sm:$0xff] %v1391_v47  ;;  %1107 = vst [vmem:[%s2029_s19 + $0xa4] sm:$0xf] %v1388_v48 }
 0x190   : > { %v520_v49 = vpop.f32.mrb[32].mxu0  ;;  %v1483_v50 = vpop.f32.mrb[32].mxu1 }
 0x191   : > { %v1398_v51 = vpack.c.bf16 %v1483_v50, %v1483_v50  ;;  %v522_v52 = vpop.f32.mrb[33].mxu0  ;;  %v697_v53 = vpop.f32.mrb[33].mxu1 }
 0x192   : > { %v1393_v54 = vpack.c.bf16 %v522_v52, %v520_v49  ;;  %v1394_v55 = vpack.c.bf16 %v697_v53, %v697_v53  ;;  %v524_v56 = vpop.f32.mrb[34].mxu0  ;;  %v1484_v57 = vpop.f32.mrb[34].mxu1 }
 0x193   : > { %1117 = vst [vmem:[%s2029_s19 + $0xe0] sm:$0xf] %v1398_v51  ;;  %v1400_v58 = vpack.c.bf16 %v1484_v57, %v1484_v57  ;;  %v526_v59 = vpop.f32.mrb[35].mxu0  ;;  %v700_v60 = vpop.f32.mrb[35].mxu1 }
 0x194   : > { %1112 = vst [vmem:[%s2029_s19 + $0xc0] sm:$0xff] %v1393_v54  ;;  %1113 = vst [vmem:[%s2029_s19 + $0xc8] sm:$0xf] %v1394_v55  ;;  %v1395_v61 = vpack.c.bf16 %v526_v59, %v524_v56  ;;  %v1396_v62 = vpack.c.bf16 %v700_v60, %v700_v60 }
 0x195   : > { %1119 = vst [vmem:[%s2029_s19 + $0xec] sm:$0xf] %v1400_v58 }
 0x196   : > { %1114 = vst [vmem:[%s2029_s19 + $0xcc] sm:$0xff] %v1395_v61  ;;  %1115 = vst [vmem:[%s2029_s19 + $0xd4] sm:$0xf] %v1396_v62 }
 0x198   : > { %v530_v63 = vpop.f32.mrb[36].mxu0  ;;  %v1487_v1 = vpop.f32.mrb[36].mxu1 }
 0x199   : > { %v1406_v2 = vpack.c.bf16 %v1487_v1, %v1487_v1  ;;  %v532_v3 = vpop.f32.mrb[37].mxu0  ;;  %v713_v4 = vpop.f32.mrb[37].mxu1 }
 0x19a   : > { %v1397_v5 = vpack.c.bf16 %v532_v3, %v530_v63  ;;  %v1402_v6 = vpack.c.bf16 %v713_v4, %v713_v4  ;;  %v534_v7 = vpop.f32.mrb[38].mxu0  ;;  %v1488_v8 = vpop.f32.mrb[38].mxu1 }
 0x19b   : > { %1125 = vst [vmem:[%s2029_s19 + $0x110] sm:$0xf] %v1406_v2  ;;  %v1408_v9 = vpack.c.bf16 %v1488_v8, %v1488_v8  ;;  %v536_v10 = vpop.f32.mrb[39].mxu0  ;;  %v716_v11 = vpop.f32.mrb[39].mxu1 }
 0x19c   : > { %1116 = vst [vmem:[%s2029_s19 + $0xd8] sm:$0xff] %v1397_v5  ;;  %1121 = vst [vmem:[%s2029_s19 + $0xf8] sm:$0xf] %v1402_v6  ;;  %v1399_v12 = vpack.c.bf16 %v536_v10, %v534_v7  ;;  %v1404_v13 = vpack.c.bf16 %v716_v11, %v716_v11 }
 0x19d   : > { %1127 = vst [vmem:[%s2029_s19 + $0x11c] sm:$0xf] %v1408_v9 }
 0x19e   : > { %1118 = vst [vmem:[%s2029_s19 + $0xe4] sm:$0xff] %v1399_v12  ;;  %1123 = vst [vmem:[%s2029_s19 + $0x104] sm:$0xf] %v1404_v13 }
 0x1a0   : > { %v540_v14 = vpop.f32.mrb[40].mxu0  ;;  %v1491_v15 = vpop.f32.mrb[40].mxu1 }
 0x1a1   : > { %v1414_v16 = vpack.c.bf16 %v1491_v15, %v1491_v15  ;;  %v542_v17 = vpop.f32.mrb[41].mxu0  ;;  %v729_v18 = vpop.f32.mrb[41].mxu1 }
 0x1a2   : > { %v1401_v19 = vpack.c.bf16 %v542_v17, %v540_v14  ;;  %v1410_v0 = vpack.c.bf16 %v729_v18, %v729_v18  ;;  %v544_v20 = vpop.f32.mrb[42].mxu0  ;;  %v1492_v21 = vpop.f32.mrb[42].mxu1 }
 0x1a3   : > { %1133 = vst [vmem:[%s2029_s19 + $0x140] sm:$0xf] %v1414_v16  ;;  %v1416_v22 = vpack.c.bf16 %v1492_v21, %v1492_v21  ;;  %v546_v23 = vpop.f32.mrb[43].mxu0  ;;  %v732_v24 = vpop.f32.mrb[43].mxu1 }
 0x1a4   : > { %1120 = vst [vmem:[%s2029_s19 + $0xf0] sm:$0xff] %v1401_v19  ;;  %1129 = vst [vmem:[%s2029_s19 + $0x128] sm:$0xf] %v1410_v0  ;;  %v1403_v25 = vpack.c.bf16 %v546_v23, %v544_v20  ;;  %v1412_v26 = vpack.c.bf16 %v732_v24, %v732_v24 }
 0x1a5   : > { %1135 = vst [vmem:[%s2029_s19 + $0x14c] sm:$0xf] %v1416_v22 }
 0x1a6   : > { %1122 = vst [vmem:[%s2029_s19 + $0xfc] sm:$0xff] %v1403_v25  ;;  %1131 = vst [vmem:[%s2029_s19 + $0x134] sm:$0xf] %v1412_v26 }
 0x1a8   : > { %v550_v27 = vpop.f32.mrb[44].mxu0  ;;  %v1495_v28 = vpop.f32.mrb[44].mxu1 }
 0x1a9   : > { %v1422_v29 = vpack.c.bf16 %v1495_v28, %v1495_v28  ;;  %v552_v30 = vpop.f32.mrb[45].mxu0  ;;  %v745_v31 = vpop.f32.mrb[45].mxu1 }
 0x1aa   : > { %v1405_v32 = vpack.c.bf16 %v552_v30, %v550_v27  ;;  %v1418_v33 = vpack.c.bf16 %v745_v31, %v745_v31  ;;  %v554_v34 = vpop.f32.mrb[46].mxu0  ;;  %v1496_v35 = vpop.f32.mrb[46].mxu1 }
 0x1ab   : > { %1141 = vst [vmem:[%s2029_s19 + $0x170] sm:$0xf] %v1422_v29  ;;  %v1424_v36 = vpack.c.bf16 %v1496_v35, %v1496_v35  ;;  %v556_v37 = vpop.f32.mrb[47].mxu0  ;;  %v748_v38 = vpop.f32.mrb[47].mxu1 }
 0x1ac   : > { %1124 = vst [vmem:[%s2029_s19 + $0x108] sm:$0xff] %v1405_v32  ;;  %1137 = vst [vmem:[%s2029_s19 + $0x158] sm:$0xf] %v1418_v33  ;;  %v1407_v39 = vpack.c.bf16 %v556_v37, %v554_v34  ;;  %v1420_v40 = vpack.c.bf16 %v748_v38, %v748_v38 }
 0x1ad   : > { %1143 = vst [vmem:[%s2029_s19 + $0x17c] sm:$0xf] %v1424_v36 }
 0x1ae   : > { %1126 = vst [vmem:[%s2029_s19 + $0x114] sm:$0xff] %v1407_v39  ;;  %1139 = vst [vmem:[%s2029_s19 + $0x164] sm:$0xf] %v1420_v40 }
 0x1af   : > { %1698 = shalt.err (!%p1695_p5)
}
 0x1b0   : > { %s1699_s3 = scalar_lea.hbm %s2095_s6, 6144  ;;  %s1703_s16 = scalar_lea.hbm %s2153_s2, 12288 }
 0x1b1   : > { %p1700_p9 = scmp.ne.s32.totalorder %s2095_s6, %s1699_s3  ;;  %p1704_p3 = scmp.lt.u32.totalorder %s2095_s6, %s2153_s2 }
 0x1b2   : > { %p1705_p7 = scmp.lt.u32.totalorder %s1703_s16, %s1699_s3  ;;  %p1707_p4 = scmp.lt.u32.totalorder %s1699_s3, %s2095_s6 }
 0x1b3   : > { %p1701_p1 = pnand %p1700_p9, %p1894_p10 }
 0x1b4   : > { %p1706_p13 = por %p1705_p7, %p1704_p3 }
 0x1b5   : > { %p1702_p2 = pneg %p1701_p1 }
 0x1b6   : > { %p1708_p6 = por %p1707_p4, %p1706_p13 }
 0x1b8   : > { %p1709_p8 = pnand %p1708_p6, %p1702_p2 }
 0x1ba   : > { %1712 = shalt.err (!%p1709_p8)
}
 0x1bb   : > { %s1781_s17 = smov 192   ;;  %s1782_s19 = smov 12  }
 0x1bc   : > { %1521 = dma.vmem_to_hbm [thread:$0]  (%p1894_p10), %s2097_s4, 6144, %s2095_s6, %s1145_s7, %s1781_s17, %s1781_s17, %s1782_s19  }
 0x1bd PF: > { %s1176_s21 = sand.u32 1, %s1751_s9   ;;  %p2171_p12 = scmp.ne.s32.totalorder %s2161_s20, 0 }
 0x1be   : > { %p2172_p11 = scmp.ge.s32.totalorder %s1771_s14, 2  ;;  %s1177_s12 = scalar_lea.sflag [#allocation4], %s1176_s21 }
 0x1c0   : > { %p1532_p0 = pnand %p2172_p11, %p2171_p12 }
 0x1c2   : > { %1746 = dma.done.wait (!%p1532_p0), %s1177_s12, 6144  }
 0x1c3   : > { %1748 = vsyncadd (!%p1532_p0), %s1177_s12, 4294961152  ;;  %s19_s14 = sadd.s32 1, %s1771_s14   ;;  %s2173_s9 = smov %s1755_s10 }
 0x1c4   : > { %p16_p5 = scmp.ge.s32.totalorder %s19_s14, 4   ;;  %s2174_s10 = smov %s1759_s11 }
 0x1c5   : > { %s2175_s11 = smov %s1903_s28  ;;  %s2176_s12 = smov %s1767_s13 }
 0x1c6   : > { %s2177_s13 = smov %s2179_s25  ;;  %18 = sbr.rel (!%p16_p5) target bundleno = 7 (0x7), region = 77 }
 0x1cd   :  { %1182 = vsyncpa [#allocation3], 1 }
 0x1ce   :  { %1184 = vsyncpa [#allocation3 + $0x1], 1 }
 0x1cf   :  { %1185 = vsyncpa [#allocation6], 1 }
 0x1d0   :  { %1186 = vsyncpa [#allocation4], 1 }
 0x1d1   :  { %1188 = vsyncpa [#allocation4 + $0x1], 1 }

</bundles_post_ra>
